<compile_context>
chip_gen: v6e
topology: v6e:2x2x1
jax: 0.10.0
libtpu: 0.0.40
codegen_flags: <defaults>
</compile_context>

<pallas_src>
import jax
import jax.numpy as jnp
from jax.experimental import pallas as pl
from jax.experimental.pallas import tpu as pltpu


def _affine_kernel(x_ref, g_ref, b_ref, o_ref):
    # Straight-line fused multiply-add; compute in f32, cast to output dtype.
    x = x_ref[...].astype(jnp.float32)
    o_ref[...] = (x * g_ref[...] + b_ref[...]).astype(o_ref.dtype)


def _vmem_capacity_bytes():
    """Physical VMEM per core (128 MiB on v5e/v6e, 64 MiB on v7x)."""
    try:
        cap = getattr(pltpu.get_tpu_info(), "vmem_capacity_bytes", None)
        if cap:
            return int(cap)
    except Exception:
        pass
    try:
        if "v7" in jax.devices()[0].device_kind.lower():
            return 64 << 20
    except Exception:
        pass
    return 64 << 20  # conservative default (safe on every generation)


def _choose_tiles(rows, hw, itemsize, block_target_bytes):
    """Pick (tile_r, tile_w) for the (rows, hw) lane-dense view.

    Prefer full-width row slabs (one contiguous HBM run per block); only tile
    the column axis when even a minimum-height slab exceeds the block budget,
    which keeps block bytes bounded for any N*C / H*W combination."""
    sub = 8 * max(1, 4 // itemsize)        # sublane pack: 8 f32 / 16 bf16 / 32 int8
    row_bytes = hw * itemsize
    min_r = min(rows, sub)

    # Fallback: column tiling (a minimum-height full-width slab is too big).
    if min_r * row_bytes > block_target_bytes and hw > 128:
        tile_w = max(128, (block_target_bytes // (min_r * itemsize)) // 128 * 128)
        if tile_w >= hw:
            tile_w = hw
        return min_r, tile_w

    # Preferred: full-width contiguous row slabs.
    tile_r = block_target_bytes // max(1, row_bytes)
    tile_r = max(min_r, min(rows, tile_r))
    if tile_r < rows:
        tile_r = (tile_r // sub) * sub
    # Split the row axis into >=2 grid steps (dual-TC on v7x) when possible.
    if tile_r >= rows and rows >= 2 * sub:
        tile_r = max(sub, ((rows // 2) // sub) * sub)
    # Prefer an evenly-dividing tile (no masked remainder block) if one is
    # within 2x of the target size.
    if tile_r < rows and rows % tile_r:
        t = tile_r
        while t >= max(sub, tile_r // 2):
            if rows % t == 0:
                tile_r = t
                break
            t -= sub
    return tile_r, hw


def _affine_jitter_pallas(x, gamma, beta):
    """fn(x) = gamma * x + beta (per-channel), as a tiled Pallas kernel."""
    N, C, H, W = x.shape
    rows, hw = N * C, H * W

    # Lane-dense 2D view of contiguous NCHW (free reshape in the wrapper).
    x2 = x.reshape(rows, hw)

    # Per-row (= per (n, c)) affine scalars as tiny (rows, 1) f32 vectors.
    g = jnp.broadcast_to(jnp.reshape(gamma, (1, C)).astype(jnp.float32), (N, C))
    b = jnp.broadcast_to(jnp.reshape(beta, (1, C)).astype(jnp.float32), (N, C))
    g_rows = g.reshape(rows, 1)
    b_rows = b.reshape(rows, 1)

    cap = _vmem_capacity_bytes()
    # Double-buffered in + out blocks ~= 4x block bytes; leave headroom for
    # the gamma/beta buffers and Mosaic internal scratch.
    block_target = min(cap // 8, 16 << 20)          # ~16 MiB v5e/v6e, ~8 MiB v7x
    vmem_limit = min(int(cap * 0.75), 100 << 20)    # ~96 MiB v5e/v6e, ~48 MiB v7x

    tile_r, tile_w = _choose_tiles(rows, hw, x.dtype.itemsize, block_target)
    grid = (pl.cdiv(rows, tile_r), pl.cdiv(hw, tile_w))

    out2 = pl.pallas_call(
        _affine_kernel,
        out_shape=jax.ShapeDtypeStruct((rows, hw), x.dtype),
        grid_spec=pltpu.PrefetchScalarGridSpec(
            num_scalar_prefetch=0,
            grid=grid,
            in_specs=[
                pl.BlockSpec((tile_r, tile_w), lambda i, j: (i, j)),
                pl.BlockSpec((tile_r, 1), lambda i, j: (i, 0)),
                pl.BlockSpec((tile_r, 1), lambda i, j: (i, 0)),
            ],
            out_specs=pl.BlockSpec((tile_r, tile_w), lambda i, j: (i, j)),
        ),
        # Elementwise same-index tiles -> in-place write is safe; with caller
        # donation the identity branch of the surrounding cond stays copy-free.
        input_output_aliases={0: 0},
        compiler_params=pltpu.CompilerParams(
            dimension_semantics=("parallel", "parallel"),
            vmem_limit_bytes=vmem_limit,
        ),
    )(x2, g_rows, b_rows)
    return out2.reshape(N, C, H, W)


def random_apply(x, gamma, beta, p, key):
    """Pallas implementation of RandomApply(fn=affine_jitter, p=p).

    Matches PyTorch: `if random.random() > p: return x; return fn(x)`, i.e.
    fn is applied when u <= p.  The identity branch skips the kernel (and all
    HBM traffic); jit with donate_argnums=(0,) so the cond output aliases x."""
    u = jax.random.uniform(key, (), dtype=jnp.float32)
    return jax.lax.cond(
        u <= jnp.float32(p),
        lambda t: _affine_jitter_pallas(t, gamma, beta),
        lambda t: t,
        x,
    )


if __name__ == "__main__":
    key = jax.random.PRNGKey(0)
    k_x, k_gate = jax.random.split(key)

    N, C, H, W = 2, 4, 16, 16
    x = jax.random.normal(k_x, (N, C, H, W), dtype=jnp.float32)

    # Deterministic "fn" parameters (per-channel affine jitter).
    gamma = jnp.linspace(0.9, 1.1, C, dtype=jnp.float32).reshape(1, C, 1, 1)
    beta = jnp.linspace(-0.05, 0.05, C, dtype=jnp.float32).reshape(1, C, 1, 1)
    p = 0.5

    # References (plain JAX), computed before any buffer is donated.
    u = jax.random.uniform(k_gate, (), dtype=jnp.float32)
    ref_fn = x * gamma + beta
    ref = jnp.where(u <= p, ref_fn, x)

    apply_jit = jax.jit(random_apply, donate_argnums=(0,))

    out = jax.block_until_ready(
        apply_jit(jnp.array(x, copy=True), gamma, beta, p, k_gate))
    assert out.shape == x.shape and out.dtype == x.dtype
    assert jnp.allclose(out, ref, atol=1e-6), "mismatch vs reference"

    # Exercise both branches explicitly (fresh donated buffer each call).
    out_id = jax.block_until_ready(
        apply_jit(jnp.array(x, copy=True), gamma, beta, 0.0, k_gate))
    assert jnp.allclose(out_id, x), "identity branch mismatch"
    out_fn = jax.block_until_ready(
        apply_jit(jnp.array(x, copy=True), gamma, beta, 1.0, k_gate))
    assert jnp.allclose(out_fn, ref_fn, atol=1e-6), "fn branch mismatch"

    print("KERNEL_OK")
</pallas_src>

<mosaic_0001>
module attributes {stable_mosaic.version = 11 : i64} {
  func.func @_affine_kernel(%arg0: i32, %arg1: i32, %arg2: memref<8x256xf32, #tpu.memory_space<vmem>>, %arg3: memref<8x1xf32, #tpu.memory_space<vmem>>, %arg4: memref<8x1xf32, #tpu.memory_space<vmem>>, %arg5: memref<8x256xf32, #tpu.memory_space<vmem>>) attributes {dimension_semantics = [#tpu.dimension_semantics<parallel>, #tpu.dimension_semantics<parallel>], iteration_bounds = array<i64: 1, 1>, scalar_prefetch = 0 : i64, scratch_operands = 0 : i64, tpu.core_type = #tpu.core_type<tc>, window_params = [{transform_indices = @transform_0, window_bounds = array<i64: 8, 256>}, {transform_indices = @transform_1, window_bounds = array<i64: 8, 1>}, {transform_indices = @transform_2, window_bounds = array<i64: 8, 1>}, {transform_indices = @transform_3, window_bounds = array<i64: 8, 256>}]} {
    %c0 = arith.constant 0 : index
    %c0_0 = arith.constant 0 : index
    %0 = vector.load %arg2[%c0, %c0_0] : memref<8x256xf32, #tpu.memory_space<vmem>>, vector<8x256xf32>
    %c0_1 = arith.constant 0 : index
    %c0_2 = arith.constant 0 : index
    %1 = vector.load %arg3[%c0_1, %c0_2] : memref<8x1xf32, #tpu.memory_space<vmem>>, vector<8x1xf32>
    %2 = vector.broadcast %1 : vector<8x1xf32> to vector<8x256xf32>
    %3 = arith.mulf %0, %2 : vector<8x256xf32>
    %c0_3 = arith.constant 0 : index
    %c0_4 = arith.constant 0 : index
    %4 = vector.load %arg4[%c0_3, %c0_4] : memref<8x1xf32, #tpu.memory_space<vmem>>, vector<8x1xf32>
    %5 = vector.broadcast %4 : vector<8x1xf32> to vector<8x256xf32>
    %6 = arith.addf %3, %5 : vector<8x256xf32>
    %c0_5 = arith.constant 0 : index
    %c0_6 = arith.constant 0 : index
    %7 = vector.load %arg5[%c0_5, %c0_6] : memref<8x256xf32, #tpu.memory_space<vmem>>, vector<8x256xf32>
    tpu.vector_store %arg5[%c0_5, %c0_6], %6 {strides = array<i32>} : memref<8x256xf32, #tpu.memory_space<vmem>>, vector<8x256xf32>,
    return
  }
  func.func @transform_0(%arg0: i32, %arg1: i32) -> (i32, i32) {
    %c0_i32 = arith.constant 0 : i32
    return %arg0, %arg1 : i32, i32
  }
  func.func @transform_1(%arg0: i32, %arg1: i32) -> (i32, i32) {
    %c0_i32 = arith.constant 0 : i32
    %c0_i32_0 = arith.constant 0 : i32
    return %arg0, %c0_i32 : i32, i32
  }
  func.func @transform_2(%arg0: i32, %arg1: i32) -> (i32, i32) {
    %c0_i32 = arith.constant 0 : i32
    %c0_i32_0 = arith.constant 0 : i32
    return %arg0, %c0_i32 : i32, i32
  }
  func.func @transform_3(%arg0: i32, %arg1: i32) -> (i32, i32) {
    %c0_i32 = arith.constant 0 : i32
    return %arg0, %arg1 : i32, i32
  }
}

</mosaic_0001>

<bundles_post_ra>
// kernel: branch_1_fun.1
= control target key start
LH: loop header
LB: loop body
LE: loop exit
PB: predicated region body
PF: predicated region fallthrough
CT: control target
= control target key end

     0   :  { %v40_v0 = vmov 0   ;;  %s79_s1 = inlined_call_operand.vmem [shape: f32[8,1], index: 1, kind: input, shape index: {}]   ;;  %s80_s2 = inlined_call_operand.vmem [shape: f32[8,1], index: 2, kind: input, shape index: {}]   ;;  %s81_s0 = inlined_call_operand.vmem [shape: f32[8,256], index: 0, kind: input, shape index: {}, may-alias: {0,3}]   ;;  %s82_s3 = inlined_call_operand.vmem [shape: f32[8,256], index: 3, kind: output, shape index: {}, may-alias: {0,3}]  }
   0x1   :  { %39 = vset.pattern.permute.xlu0 %v40_v0  ;;  %v16_v1 = vld [vmem:[%s79_s1] sm:$0xff]  ;;  %v15_v5 = vld [vmem:[%s81_s0 + $0x8] sm:$0xff] }
   0x2   :  { %19 = vperm.xlu0 %39, %v16_v1   ;;  %v24_v2 = vld [vmem:[%s80_s2] sm:$0xff] }
   0x3   :  { %v14_v4 = vld [vmem:[%s81_s0] sm:$0xff] }
   0x6   :  { %27 = vperm.xlu0 %39, %v24_v2  }
  0x7d   :  { %v20_v3 = vpop.permute.xlu0 %19 }
  0x7e   :  { %v22_v6 = vmul.f32 %v20_v3, %v14_v4  ;;  %v23_v7 = vmul.f32 %v20_v3, %v15_v5 }
  0x81   :  { %v28_v8 = vpop.permute.xlu0 %27 }
  0x82   :  { %v30_v9 = vadd.f32 %v28_v8, %v22_v6  ;;  %v31_v10 = vadd.f32 %v28_v8, %v23_v7 }
  0x84   :  { %32 = vst [vmem:[%s82_s3] sm:$0xff] %v30_v9  ;;  %33 = vst [vmem:[%s82_s3 + $0x8] sm:$0xff] %v31_v10 }

</bundles_post_ra>
